<compile_context>
chip_gen: v5e
topology: v5e:2x2
jax: 0.10.0
libtpu: 0.0.40
codegen_flags: <defaults>
</compile_context>

<pallas_src>
import functools

import jax
import jax.numpy as jnp
from jax.experimental import pallas as pl
from jax.experimental.pallas import tpu as pltpu


def _lst_layer_kernel(hidx_ref, widx_ref, z_ref, hs_ref, aw_ref, b_ref, o_ref,
                      acc_ref, *, num_expert, r, num_layers, scaling):
    """Grid = (token_tiles, L+1).  j==0 seeds the f32 carry from hidden_states[0];
    j=1..L runs layer j-1; the bf16 output is emitted once at j==L."""
    j = pl.program_id(1)
    er = num_expert * r                      # width of the LoRA-A column group

    @pl.when(j == 0)
    def _seed():
        acc_ref[...] = hs_ref[...].astype(jnp.float32)

    @pl.when(j > 0)
    def _layer():
        l = j - 1
        z = z_ref[l]                                      # sigmoid(gate_l), SMEM scalar
        h_x = hs_ref[...].astype(jnp.float32)
        x = z * acc_ref[...] + (1.0 - z) * h_x
        x_bf = x.astype(jnp.bfloat16)

        # Fused matmul: t_full = x @ [A_all^T | Wg^T]  -> (TN, E*r + E), f32 accum.
        tf = jnp.dot(x_bf, aw_ref[...], preferred_element_type=jnp.float32)

        col = jax.lax.broadcasted_iota(jnp.int32, tf.shape, 1)
        is_gate = col >= er
        lg = jnp.where(is_gate, tf, -jnp.inf)             # gate logits (others masked)
        m = jnp.max(lg, axis=-1, keepdims=True)
        denom = jnp.sum(jnp.exp(lg - m), axis=-1, keepdims=True)
        p_sel = pl.reciprocal(denom, approx=False)        # softmax prob at the argmax
        chosen = jnp.min(jnp.where(jnp.logical_and(is_gate, tf == m),
                                   col - er, num_expert),
                         axis=-1, keepdims=True)          # first argmax expert, (TN,1)

        lo = chosen * r
        keep = jnp.logical_and(col >= lo, col < lo + r)   # routed expert's r cols only
        t = jnp.where(keep, tf * (scaling * p_sel), 0.0)  # scale folded into narrow t
        y = jnp.dot(t.astype(jnp.bfloat16), b_ref[...],
                    preferred_element_type=jnp.float32)   # (TN, H)
        acc_ref[...] = y

    @pl.when(j == num_layers)
    def _emit():
        o_ref[...] = acc_ref[...].astype(o_ref.dtype)


def _vmem_cap_bytes():
    cap = 128 * 1024 * 1024
    try:
        info = pltpu.get_tpu_info()
        cap = int(getattr(info, "vmem_capacity_bytes", cap))
    except Exception:
        pass
    return (cap * 4) // 5      # ~20% headroom for Mosaic internal scratch


def _estimate_vmem(tn, H, EC):
    return (2 * tn * H * 2      # hs double buffer (bf16)
            + 2 * H * EC * 2    # [A|Wg] double buffer (bf16)
            + 2 * EC * H * 2    # B double buffer (bf16)
            + 2 * tn * H * 2    # bf16 output double buffer
            + tn * H * 4        # f32 carry scratch
            + 4 * tn * H * 4)   # in-kernel temporaries headroom


def lst_quant_core(hidden_states, gates, w_gate, a_w, b_w, scaling, *, tile_n=512):
    """Runs the layer recurrence in a single pallas_call with grid=(token_tiles, L+1)."""
    Lp1, B, S, H = hidden_states.shape
    L = Lp1 - 1
    E = w_gate.shape[1]
    r = a_w.shape[2]
    EC = E * r + E
    N = B * S

    # Token tile: aim for >=2 tiles (keeps v7x's 2nd TensorCore busy), rows mult. of 8,
    # then shrink until the estimated footprint fits the per-generation VMEM cap.
    cap = _vmem_cap_bytes()
    half = -(-N // 2)
    tn = min(tile_n, max(8, -(-half // 8) * 8))
    while tn > 8 and _estimate_vmem(tn, H, EC) > cap:
        tn = max(8, ((tn // 2) + 7) // 8 * 8)
    num_tiles = -(-N // tn)
    n_pad = num_tiles * tn

    # Stream hidden states in bf16 (pad rows to a tile multiple); kernel math is f32.
    hs = hidden_states.reshape(Lp1, N, H)
    if n_pad != N:
        hs = jnp.pad(hs, ((0, 0), (0, n_pad - N), (0, 0)))
    hs = hs.astype(jnp.bfloat16)

    # Per-layer weights, pre-transposed + fused, streamed in bf16:
    #   [A_all^T | Wg^T] : (L, H, E*r + E)     -> one matmul gives LoRA-A cols + gate logits
    #   B_all (zero-padded to E*r+E rows) : (L, E*r+E, H)
    a_t = jnp.transpose(a_w.reshape(L, E * r, H), (0, 2, 1))
    wg_t = jnp.transpose(w_gate, (0, 2, 1))
    aw_cat = jnp.concatenate([a_t, wg_t], axis=-1).astype(jnp.bfloat16)
    b_all = jnp.swapaxes(b_w, 2, 3).reshape(L, E * r, H)
    b_pad = jnp.concatenate([b_all, jnp.zeros((L, E, H), b_all.dtype)],
                            axis=1).astype(jnp.bfloat16)

    # L scalar gates z_i = sigmoid(gate_i), read from SMEM inside the kernel.
    zs = jax.nn.sigmoid(gates.astype(jnp.float32))

    # PyTorch quirk: layer i mixes with hidden_states[max(i, 1)] (h_x is updated
    # *after* the peft call).  Grid step 0 reads hidden_states[0] (carry seed).
    hidx = jnp.concatenate([jnp.zeros((1,), jnp.int32),
                            jnp.maximum(jnp.arange(L, dtype=jnp.int32), 1)])
    widx = jnp.concatenate([jnp.zeros((1,), jnp.int32),
                            jnp.arange(L, dtype=jnp.int32)])

    vmem_limit = int(min(cap, max(2 * _estimate_vmem(tn, H, EC), 32 * 1024 * 1024)))

    kernel = functools.partial(_lst_layer_kernel, num_expert=E, r=r,
                               num_layers=L, scaling=float(scaling))

    x_final = pl.pallas_call(
        kernel,
        out_shape=jax.ShapeDtypeStruct((n_pad, H), jnp.bfloat16),
        grid_spec=pltpu.PrefetchScalarGridSpec(
            num_scalar_prefetch=2,                     # hidx, widx -> SMEM for index_maps
            grid=(num_tiles, L + 1),                   # token tiles outer, layers inner
            in_specs=[
                pl.BlockSpec(memory_space=pltpu.MemorySpace.SMEM),               # zs (L,)
                pl.BlockSpec((None, tn, H), lambda n, j, hi, wi: (hi[j], n, 0)), # hs
                pl.BlockSpec((None, H, EC), lambda n, j, hi, wi: (wi[j], 0, 0)), # [A|Wg]
                pl.BlockSpec((None, EC, H), lambda n, j, hi, wi: (wi[j], 0, 0)), # B
            ],
            out_specs=pl.BlockSpec((tn, H), lambda n, j, hi, wi: (n, 0)),
            scratch_shapes=[pltpu.VMEM((tn, H), jnp.float32)],                   # carry
        ),
        compiler_params=pltpu.CompilerParams(
            dimension_semantics=("parallel", "arbitrary"),
            vmem_limit_bytes=vmem_limit,
        ),
    )(hidx, widx, zs, hs, aw_cat, b_pad)
    return x_final[:N]


def lst_quant_forward(hidden_states, input_ids, gates, w_gate, a_w, b_w,
                      w_score, scaling, pad_token_id):
    Lp1, B, S, H = hidden_states.shape
    x_final = lst_quant_core(hidden_states, gates, w_gate, a_w, b_w, scaling)
    # LLM.score head + pooled-logit gather (glue, plain JAX).
    logits = (x_final.astype(jnp.float32) @ w_score.T).reshape(B, S, -1)
    seq_lens = jnp.sum((input_ids != pad_token_id).astype(jnp.int32), axis=-1) - 1
    pooled_logits = logits[jnp.arange(B), seq_lens]
    return pooled_logits


# ----------------------------- pure-JAX reference -----------------------------
def reference_forward(hidden_states, input_ids, gates, w_gate, a_w, b_w,
                      w_score, scaling, pad_token_id):
    # Mirrors the kernel's precision choices (bf16 streamed operands, f32 accumulation,
    # bf16 final carry) so routing decisions and magnitudes agree.
    Lp1, B, S, H = hidden_states.shape
    L = Lp1 - 1
    E = w_gate.shape[1]
    hs = hidden_states.reshape(Lp1, B * S, H).astype(jnp.bfloat16).astype(jnp.float32)
    wg_bf = w_gate.astype(jnp.bfloat16)
    a_bf = a_w.astype(jnp.bfloat16)
    b_bf = b_w.astype(jnp.bfloat16)
    x = hs[0]
    h_x = hs[1]
    for i in range(L):
        z = jax.nn.sigmoid(gates[i])
        x = z * x + (1.0 - z) * h_x
        x_bf = x.astype(jnp.bfloat16)
        lg = jnp.dot(x_bf, wg_bf[i].T, preferred_element_type=jnp.float32)
        prob = jax.nn.softmax(lg, axis=-1)
        chosen = jnp.argmax(lg, axis=-1)
        p_sel = jnp.take_along_axis(prob, chosen[:, None], axis=-1)
        y = jnp.zeros_like(x)
        for e in range(E):
            t = jnp.dot(x_bf, a_bf[i, e].T, preferred_element_type=jnp.float32)
            t = (t * (scaling * p_sel)).astype(jnp.bfloat16)
            ye = jnp.dot(t, b_bf[i, e].T, preferred_element_type=jnp.float32)
            y = y + ye * (chosen == e)[:, None].astype(jnp.float32)
        x = y
        h_x = hs[i + 1]
    x = x.astype(jnp.bfloat16).astype(jnp.float32)
    logits = (x @ w_score.T).reshape(B, S, -1)
    seq_lens = jnp.sum((input_ids != pad_token_id).astype(jnp.int32), axis=-1) - 1
    return logits[jnp.arange(B), seq_lens]


if __name__ == "__main__":
    # Small, deterministic synthetic config (lane-dense H = 128, N = 32 tokens).
    B, S, H = 2, 16, 128        # batch, seq, hidden_size
    L, E = 3, 2                 # num_hidden_layers, num_expert
    r, alpha_r = 8, 16
    num_labels = 4
    pad_token_id = 0
    scaling = r / alpha_r       # MoEAdaptorsLinear.scaling

    key = jax.random.PRNGKey(0)
    ks = jax.random.split(key, 6)

    # "hidden_states" as produced by the frozen LLM: (L+1, B, S, H).
    hidden_states = jax.random.normal(ks[0], (L + 1, B, S, H), jnp.float32) * 0.5
    # nn.Parameter(torch.tensor([0.5])) per layer.
    gates = jnp.full((L,), 0.5, jnp.float32)
    # Per-layer MoE gate: nn.Linear(H, E, bias=False) -> weight (E, H).
    w_gate = jax.random.normal(ks[1], (L, E, H), jnp.float32) * 0.1
    # Per-layer, per-expert LoRA: adapter_A (r, H), adapter_B (H, r), no bias.
    a_w = jax.random.normal(ks[2], (L, E, r, H), jnp.float32) * (1.0 / jnp.sqrt(H))
    b_w = jax.random.normal(ks[3], (L, E, H, r), jnp.float32) * (1.0 / jnp.sqrt(r))
    # LLM.score head: nn.Linear(H, num_labels, bias=False) -> weight (num_labels, H).
    w_score = jax.random.normal(ks[4], (num_labels, H), jnp.float32) * 0.05
    # input_ids with some trailing padding in example 1.
    input_ids = jax.random.randint(ks[5], (B, S), 1, 50)
    input_ids = input_ids.at[1, -2:].set(pad_token_id)

    pooled = lst_quant_forward(hidden_states, input_ids, gates, w_gate, a_w, b_w,
                               w_score, scaling, pad_token_id)
    pooled = jax.block_until_ready(pooled)

    ref = reference_forward(hidden_states, input_ids, gates, w_gate, a_w, b_w,
                            w_score, scaling, pad_token_id)

    assert pooled.shape == (B, num_labels), pooled.shape
    assert jnp.allclose(pooled, ref, atol=2e-2, rtol=2e-2), (pooled, ref)
    print("KERNEL_OK")
</pallas_src>

<mosaic_0001>
module attributes {stable_mosaic.version = 11 : i64} {
  func.func @_lst_layer_kernel(%arg0: i32, %arg1: i32, %arg2: memref<4xi32, #tpu.memory_space<smem>>, %arg3: memref<4xi32, #tpu.memory_space<smem>>, %arg4: memref<3xf32, #tpu.memory_space<smem>>, %arg5: memref<1x16x128xbf16, #tpu.memory_space<vmem>>, %arg6: memref<1x128x18xbf16, #tpu.memory_space<vmem>>, %arg7: memref<1x18x128xbf16, #tpu.memory_space<vmem>>, %arg8: memref<16x128xbf16, #tpu.memory_space<vmem>>, %arg9: memref<16x128xf32, #tpu.memory_space<vmem>>) attributes {dimension_semantics = [#tpu.dimension_semantics<parallel>, #tpu.dimension_semantics<arbitrary>], iteration_bounds = array<i64: 2, 4>, scalar_prefetch = 2 : i64, scratch_operands = 1 : i64, tpu.core_type = #tpu.core_type<tc>, window_params = [{transform_indices = @transform_0, window_bounds = array<i64: 3>}, {transform_indices = @transform_1, window_bounds = array<i64: 1, 16, 128>}, {transform_indices = @transform_2, window_bounds = array<i64: 1, 128, 18>}, {transform_indices = @transform_3, window_bounds = array<i64: 1, 18, 128>}, {transform_indices = @transform_4, window_bounds = array<i64: 16, 128>}]} {
    %c0_i32 = arith.constant 0 : i32
    %0 = arith.cmpi eq, %arg1, %c0_i32 : i32
    %1 = arith.extui %0 : i1 to i32
    %c0_i32_0 = arith.constant 0 : i32
    %2 = arith.cmpi ne, %1, %c0_i32_0 : i32
    scf.if %2 {
      %c0 = arith.constant 0 : index
      %c0_4 = arith.constant 0 : index
      %c0_5 = arith.constant 0 : index
      %9 = vector.load %arg5[%c0, %c0_4, %c0_5] : memref<1x16x128xbf16, #tpu.memory_space<vmem>>, vector<1x16x128xbf16>
      %10 = vector.shape_cast %9 : vector<1x16x128xbf16> to vector<16x128xbf16>
      %11 = arith.extf %10 : vector<16x128xbf16> to vector<16x128xf32>
      %c0_6 = arith.constant 0 : index
      %c0_7 = arith.constant 0 : index
      %12 = vector.load %arg9[%c0_6, %c0_7] : memref<16x128xf32, #tpu.memory_space<vmem>>, vector<16x128xf32>
      tpu.vector_store %arg9[%c0_6, %c0_7], %11 {strides = array<i32>} : memref<16x128xf32, #tpu.memory_space<vmem>>, vector<16x128xf32>,
    } else {
    }
    %c0_i32_1 = arith.constant 0 : i32
    %3 = arith.cmpi sgt, %arg1, %c0_i32_1 : i32
    %4 = arith.extui %3 : i1 to i32
    %c0_i32_2 = arith.constant 0 : i32
    %5 = arith.cmpi ne, %4, %c0_i32_2 : i32
    scf.if %5 {
      %c1_i32 = arith.constant 1 : i32
      %9 = arith.subi %arg1, %c1_i32 : i32
      %10 = arith.index_cast %9 : i32 to index
      %11 = memref.load %arg4[%10] : memref<3xf32, #tpu.memory_space<smem>>
      %c0 = arith.constant 0 : index
      %c0_4 = arith.constant 0 : index
      %c0_5 = arith.constant 0 : index
      %12 = vector.load %arg5[%c0, %c0_4, %c0_5] : memref<1x16x128xbf16, #tpu.memory_space<vmem>>, vector<1x16x128xbf16>
      %13 = vector.shape_cast %12 : vector<1x16x128xbf16> to vector<16x128xbf16>
      %14 = arith.extf %13 : vector<16x128xbf16> to vector<16x128xf32>
      %c0_6 = arith.constant 0 : index
      %c0_7 = arith.constant 0 : index
      %15 = vector.load %arg9[%c0_6, %c0_7] : memref<16x128xf32, #tpu.memory_space<vmem>>, vector<16x128xf32>
      %16 = vector.broadcast %11 : f32 to vector<16x128xf32>
      %17 = arith.mulf %16, %15 : vector<16x128xf32>
      %cst = arith.constant 1.000000e+00 : f32
      %18 = arith.subf %cst, %11 : f32
      %19 = vector.broadcast %18 : f32 to vector<16x128xf32>
      %20 = arith.mulf %19, %14 : vector<16x128xf32>
      %21 = arith.addf %17, %20 : vector<16x128xf32>
      %22 = arith.truncf %21 : vector<16x128xf32> to vector<16x128xbf16>
      %c0_8 = arith.constant 0 : index
      %c0_9 = arith.constant 0 : index
      %c0_10 = arith.constant 0 : index
      %23 = vector.load %arg6[%c0_8, %c0_9, %c0_10] : memref<1x128x18xbf16, #tpu.memory_space<vmem>>, vector<1x128x18xbf16>
      %24 = vector.shape_cast %23 : vector<1x128x18xbf16> to vector<128x18xbf16>
      %cst_11 = arith.constant dense<0.000000e+00> : vector<16x18xf32>
      %25 = tpu.matmul %22, %24, %cst_11 {dimension_numbers = #tpu.dot_dimension_numbers<[1], [0], [0], [1], [0, 0, 1, 1], [], []>} : vector<16x128xbf16>, vector<128x18xbf16>, vector<16x18xf32> -> vector<16x18xf32>
      %26 = tpu.iota {dimensions = array<i32: 1>} : vector<16x18xi32>
      %c16_i32 = arith.constant 16 : i32
      %27 = vector.broadcast %c16_i32 : i32 to vector<16x18xi32>
      %28 = arith.cmpi sge, %26, %27 : vector<16x18xi32>
      %cst_12 = arith.constant 0xFF800000 : f32
      %29 = vector.broadcast %cst_12 : f32 to vector<16x18xf32>
      %30 = arith.select %28, %25, %29 : vector<16x18xi1>, vector<16x18xf32>
      %cst_13 = arith.constant dense<0xFF800000> : vector<16xf32>
      %31 = vector.multi_reduction <maximumf>, %30, %cst_13 [1] : vector<16x18xf32> to vector<16xf32>
      %32 = vector.shape_cast %31 : vector<16xf32> to vector<16x1xf32>
      %33 = vector.broadcast %32 : vector<16x1xf32> to vector<16x18xf32>
      %34 = arith.subf %30, %33 : vector<16x18xf32>
      %35 = math.exp %34 : vector<16x18xf32>
      %cst_14 = arith.constant dense<0.000000e+00> : vector<16xf32>
      %36 = vector.multi_reduction <add>, %35, %cst_14 [1] : vector<16x18xf32> to vector<16xf32>
      %37 = vector.shape_cast %36 : vector<16xf32> to vector<16x1xf32>
      %38 = tpu.reciprocal %37 : vector<16x1xf32> -> vector<16x1xf32>
      %39 = vector.broadcast %32 : vector<16x1xf32> to vector<16x18xf32>
      %40 = arith.cmpf oeq, %25, %39 : vector<16x18xf32>
      %41 = arith.andi %28, %40 : vector<16x18xi1>
      %c16_i32_15 = arith.constant 16 : i32
      %42 = vector.broadcast %c16_i32_15 : i32 to vector<16x18xi32>
      %43 = arith.subi %26, %42 : vector<16x18xi32>
      %c2_i32 = arith.constant 2 : i32
      %44 = vector.broadcast %c2_i32 : i32 to vector<16x18xi32>
      %45 = arith.select %41, %43, %44 : vector<16x18xi1>, vector<16x18xi32>
      %cst_16 = arith.constant dense<2147483647> : vector<16xi32>
      %46 = vector.multi_reduction <minsi>, %45, %cst_16 [1] : vector<16x18xi32> to vector<16xi32>
      %47 = vector.shape_cast %46 : vector<16xi32> to vector<16x1xi32>
      %c8_i32 = arith.constant 8 : i32
      %48 = vector.broadcast %c8_i32 : i32 to vector<16x1xi32>
      %49 = arith.muli %47, %48 : vector<16x1xi32>
      %50 = vector.broadcast %49 : vector<16x1xi32> to vector<16x18xi32>
      %51 = arith.cmpi sge, %26, %50 : vector<16x18xi32>
      %c8_i32_17 = arith.constant 8 : i32
      %52 = vector.broadcast %c8_i32_17 : i32 to vector<16x1xi32>
      %53 = arith.addi %49, %52 : vector<16x1xi32>
      %54 = vector.broadcast %53 : vector<16x1xi32> to vector<16x18xi32>
      %55 = arith.cmpi slt, %26, %54 : vector<16x18xi32>
      %56 = arith.andi %51, %55 : vector<16x18xi1>
      %cst_18 = arith.constant 5.000000e-01 : f32
      %57 = vector.broadcast %cst_18 : f32 to vector<16x1xf32>
      %58 = arith.mulf %57, %38 : vector<16x1xf32>
      %59 = vector.broadcast %58 : vector<16x1xf32> to vector<16x18xf32>
      %60 = arith.mulf %25, %59 : vector<16x18xf32>
      %cst_19 = arith.constant 0.000000e+00 : f32
      %61 = vector.broadcast %cst_19 : f32 to vector<16x18xf32>
      %62 = arith.select %56, %60, %61 : vector<16x18xi1>, vector<16x18xf32>
      %63 = arith.truncf %62 : vector<16x18xf32> to vector<16x18xbf16>
      %c0_20 = arith.constant 0 : index
      %c0_21 = arith.constant 0 : index
      %c0_22 = arith.constant 0 : index
      %64 = vector.load %arg7[%c0_20, %c0_21, %c0_22] : memref<1x18x128xbf16, #tpu.memory_space<vmem>>, vector<1x18x128xbf16>
      %65 = vector.shape_cast %64 : vector<1x18x128xbf16> to vector<18x128xbf16>
      %cst_23 = arith.constant dense<0.000000e+00> : vector<16x128xf32>
      %66 = tpu.matmul %63, %65, %cst_23 {dimension_numbers = #tpu.dot_dimension_numbers<[1], [0], [0], [1], [0, 0, 1, 1], [], []>} : vector<16x18xbf16>, vector<18x128xbf16>, vector<16x128xf32> -> vector<16x128xf32>
      %c0_24 = arith.constant 0 : index
      %c0_25 = arith.constant 0 : index
      %67 = vector.load %arg9[%c0_24, %c0_25] : memref<16x128xf32, #tpu.memory_space<vmem>>, vector<16x128xf32>
      tpu.vector_store %arg9[%c0_24, %c0_25], %66 {strides = array<i32>} : memref<16x128xf32, #tpu.memory_space<vmem>>, vector<16x128xf32>,
    } else {
    }
    %c3_i32 = arith.constant 3 : i32
    %6 = arith.cmpi eq, %arg1, %c3_i32 : i32
    %7 = arith.extui %6 : i1 to i32
    %c0_i32_3 = arith.constant 0 : i32
    %8 = arith.cmpi ne, %7, %c0_i32_3 : i32
    scf.if %8 {
      %c0 = arith.constant 0 : index
      %c0_4 = arith.constant 0 : index
      %9 = vector.load %arg9[%c0, %c0_4] : memref<16x128xf32, #tpu.memory_space<vmem>>, vector<16x128xf32>
      %10 = arith.truncf %9 : vector<16x128xf32> to vector<16x128xbf16>
      %c0_5 = arith.constant 0 : index
      %c0_6 = arith.constant 0 : index
      %11 = vector.load %arg8[%c0_5, %c0_6] : memref<16x128xbf16, #tpu.memory_space<vmem>>, vector<16x128xbf16>
      tpu.vector_store %arg8[%c0_5, %c0_6], %10 {strides = array<i32>} : memref<16x128xbf16, #tpu.memory_space<vmem>>, vector<16x128xbf16>,
    } else {
    }
    return
  }
  func.func @transform_0(%arg0: i32, %arg1: i32, %arg2: memref<4xi32, #tpu.memory_space<smem>>, %arg3: memref<4xi32, #tpu.memory_space<smem>>) -> i32 {
    %c0_i32 = arith.constant 0 : i32
    %c0_i32_0 = arith.constant 0 : i32
    return %c0_i32 : i32
  }
  func.func @transform_1(%arg0: i32, %arg1: i32, %arg2: memref<4xi32, #tpu.memory_space<smem>>, %arg3: memref<4xi32, #tpu.memory_space<smem>>) -> (i32, i32, i32) {
    %0 = arith.index_cast %arg1 : i32 to index
    %1 = memref.load %arg2[%0] : memref<4xi32, #tpu.memory_space<smem>>
    %c0_i32 = arith.constant 0 : i32
    %c0_i32_0 = arith.constant 0 : i32
    return %1, %arg0, %c0_i32 : i32, i32, i32
  }
  func.func @transform_2(%arg0: i32, %arg1: i32, %arg2: memref<4xi32, #tpu.memory_space<smem>>, %arg3: memref<4xi32, #tpu.memory_space<smem>>) -> (i32, i32, i32) {
    %0 = arith.index_cast %arg1 : i32 to index
    %1 = memref.load %arg3[%0] : memref<4xi32, #tpu.memory_space<smem>>
    %c0_i32 = arith.constant 0 : i32
    %c0_i32_0 = arith.constant 0 : i32
    %c0_i32_1 = arith.constant 0 : i32
    return %1, %c0_i32, %c0_i32_0 : i32, i32, i32
  }
  func.func @transform_3(%arg0: i32, %arg1: i32, %arg2: memref<4xi32, #tpu.memory_space<smem>>, %arg3: memref<4xi32, #tpu.memory_space<smem>>) -> (i32, i32, i32) {
    %0 = arith.index_cast %arg1 : i32 to index
    %1 = memref.load %arg3[%0] : memref<4xi32, #tpu.memory_space<smem>>
    %c0_i32 = arith.constant 0 : i32
    %c0_i32_0 = arith.constant 0 : i32
    %c0_i32_1 = arith.constant 0 : i32
    return %1, %c0_i32, %c0_i32_0 : i32, i32, i32
  }
  func.func @transform_4(%arg0: i32, %arg1: i32, %arg2: memref<4xi32, #tpu.memory_space<smem>>, %arg3: memref<4xi32, #tpu.memory_space<smem>>) -> (i32, i32) {
    %c0_i32 = arith.constant 0 : i32
    %c0_i32_0 = arith.constant 0 : i32
    return %arg0, %c0_i32 : i32, i32
  }
}

</mosaic_0001>

<bundles_post_ra>
// kernel: tpu_custom_call.1
= control target key start
LH: loop header
LB: loop body
LE: loop exit
PB: predicated region body
PF: predicated region fallthrough
CT: control target
= control target key end

     0   :  { %s1029_s27 = smov [#allocation4]   ;;  %s1030_s28 = smov [#allocation5]   ;;  %s1271_s0 = inlined_call_operand.vmem [shape: s32[4], index: 0, kind: input, shape index: {}]   ;;  %s1272_s2 = inlined_call_operand.vmem [shape: f32[3], index: 2, kind: input, shape index: {}]   ;;  %s1273_s3 = inlined_call_operand.vmem [shape: bf16[4,32,128], index: 3, kind: input, shape index: {}]   ;;  %s1274_s4 = inlined_call_operand.vmem [shape: bf16[3,128,18], index: 4, kind: input, shape index: {}]   ;;  %s1275_s5 = inlined_call_operand.vmem [shape: bf16[3,18,128], index: 5, kind: input, shape index: {}]   ;;  %s1276_s6 = inlined_call_operand.hbm [shape: bf16[32,128], index: 6, kind: output, shape index: {}]   ;;  %s1277_s1 = inlined_call_operand.vmem [shape: s32[4], index: 1, kind: input, shape index: {}]  }
   0x1   :  { %1282 = sst [smem:[#allocation17_spill]] %s1272_s2  ;;  %s12_s23 = sshll.u32 %s1271_s0, 4  ;;  %s13_s23 = int_to_ptr.vmem [resolvable:$true] %s12_s23 }
   0x2   :  { %s17_s26 = sshll.u32 %s1277_s1, 4  ;;  %s18_s26 = int_to_ptr.vmem [resolvable:$true] %s17_s26 }
   0x3   :  { %15 = dma.vmem_to_smem %s13_s23, 16, %s1029_s27, [#allocation3] }
   0x4   :  { %20 = dma.vmem_to_smem %s18_s26, 16, %s1030_s28, [#allocation3] }
   0x5   :  { %987 = dma.done.wait [#allocation3], 32 }
   0x6   :  { %988 = vsyncadd [#allocation3], 4294967264 }
   0x7   :  { %23 = sfence }
   0x8   :  { %24 = vsyncpa [#allocation8], 0 }
   0x9   :  { %25 = vsyncpa [#allocation7], 0 }
   0xa   :  { %27 = vsyncpa [#allocation7 + $0x1], 0  ;;  %s1075_s29 = smov 0   ;;  %s1077_s30 = smov 0  }
   0xb   :  { %s1079_s0 = smov 0   ;;  %s1081_s7 = smov 0  }
   0xc   :  { %s1083_s1 = smov 0   ;;  %s1085_s8 = smov 0  }
   0xd   :  { %s1087_s9 = smov 0   ;;  %s1089_s10 = smov 0  }
   0xe LB: > { %1283 = sst [smem:[#allocation13_spill]] %s1019_s8  ;;  %s708_s11 = sadd.s32 4294967295, %s1027_s10   ;;  %s1027_s10 = sphi %s1089_s10, %s33_s10   ;;  %s1023_s9 = sphi %s1087_s9, %s1296_s9   ;;  %s1019_s8 = sphi %s1085_s8, %s1295_s8   ;;  %s1015_s1 = sphi %s1083_s1, %s1294_s1   ;;  %s1011_s7 = sphi %s1081_s7, %s1293_s7   ;;  %s1007_s0 = sphi %s1079_s0, %s1299_s0   ;;  %s1003_s30 = sphi %s1077_s30, %s1298_s30   ;;  %s999_s29 = sphi %s1075_s29, %s1297_s29  }
   0xf   : > { %1284 = sst [smem:[#allocation14_spill]] %s1023_s9  ;;  %s709_s12 = sadd.s32 4294967294, %s1027_s10  }
  0x10   : > { %s42_s13 = sadd.s32 1, %s1019_s8  ;;  %s45_s14 = sadd.s32 1, %s1023_s9 }
  0x11   : > { %p43_p0 = scmp.ge.s32.totalorder %s42_s13, 4  ;;  %s159_s15 = sadd.s32 1, %s1007_s0 }
  0x12   : > { %p169_p1 = scmp.ne.s32.totalorder %s1007_s0, %s1003_s30  ;;  %p170_p2 = scmp.eq.s32.totalorder %s708_s11, 7 }
  0x13   : > { %s1301_s13 = smov (%p43_p0, %s42_s13), 0  ;;  %s1303_s14 = smov (!%p43_p0, %s45_s14), %s1023_s9 }
  0x14   : > { %1285 = sst [smem:[#allocation15_spill]] %s1301_s13  ;;  %p1125_p3 = por %p170_p2, %p169_p1 }
  0x15   : > { %p175_p4 = scmp.ne.s32.totalorder %s1003_s30, %s999_s29  ;;  %p47_p5 = scmp.ge.s32.totalorder %s1303_s14, 2 }
  0x16   : > { %p176_p6 = scmp.eq.s32.totalorder %s709_s12, 7  ;;  %p710_p7 = scmp.ge.s32.totalorder %s1027_s10, 1 }
  0x17   : > { %p183_p8 = scmp.lt.s32.totalorder %s1027_s10, 9  ;;  %s1305_s14 = smov (%p47_p5, %s1303_s14), 0 }
  0x18   : > { %1287 = sst [smem:[#allocation16_spill]] %s1305_s14  ;;  %p1135_p9 = por %p176_p6, %p175_p4 }
  0x19   : > { %p184_p10 = pnand %p710_p7, %p183_p8  ;;  %s156_s18 = ssub.s32 %s1023_s9, %s1305_s14 }
  0x1a   : > { %p157_p11 = scmp.eq.s32.totalorder %s156_s18, 0  ;;  %p808_p13 = scmp.eq.s32.totalorder %s708_s11, 0 }
  0x1b   : > { %p800_p12 = pneg %p184_p10  ;;  %s1289_s2 = sld [smem:[#allocation17_spill]] }
  0x1c   : > { %s1145_s22 = scalar_select %p157_p11, %s1007_s0, %s159_s15  }
  0x1d   : > { %p801_p0 = pnand %p808_p13, %p800_p12  ;;  %s1031_s23 = smov [#allocation6]  }
  0x1e   : > { %243 = sbr.rel (%p184_p10) target bundleno = 770 (0x302), region = 36 }
  0x21   : > { %s195_s21 = sshll.u32 %s1289_s2, 4  ;;  %s196_s21 = int_to_ptr.vmem [resolvable:$true] %s195_s21 }
  0x22   : > { %803 = dma.vmem_to_smem (!%p801_p0), %s196_s21, 16, %s1031_s23, [#allocation8]  }
  0x23   : > { %990 = dma.done.wait (%p808_p13), [#allocation8], 16  }
  0x24   : > { %992 = vsyncadd (%p808_p13), [#allocation8], 4294967280 }
  0x25   : > { %250 = sfence }
  0x26   : > { %s1278_s24 = sand.u32 1, %s1003_s30   ;;  %s288_s25 = sld [smem:[#allocation4 + %s1011_s7]] }
  0x27   : > { %s1151_s26 = sshll.u32 %s1278_s24, 3  ;;  %s716_s27 = sshll.u32 %s1015_s1, 1 }
  0x28   : > { %p292_p1 = scmp.lt.s32.totalorder %s716_s27, 3  ;;  %s300_s28 = sld [smem:[#allocation5 + %s1011_s7]] }
  0x29   : > { %s307_s11 = sld [smem:[#allocation5 + %s1011_s7]]  ;;  %p722_p6 = scmp.ne.s32.totalorder %s1011_s7, 0 }
  0x2a   : > { %s1307_s27 = smov (!%p292_p1, %s716_s27), 3 }
  0x2c   : > { %p290_p2 = scmp.lt.s32.totalorder %s288_s25, 3 }
  0x2e   : > { %s1309_s25 = smov (!%p290_p2, %s288_s25), 3  ;;  %p301_p4 = scmp.lt.s32.totalorder %s300_s28, 2 }
  0x2f   : > { %s717_s12 = sshll.u32 %s1309_s25, 2  ;;  %p308_p5 = scmp.lt.s32.totalorder %s307_s11, 2 }
  0x30   : > { %s295_s15 = sadd.s32 %s717_s12, %s1307_s27  ;;  %s1311_s28 = smov (!%p301_p4, %s300_s28), 2 }
  0x31   : > { %s718_s18 = sshll.u32 %s295_s15, 2  ;;  %s1313_s11 = smov (!%p308_p5, %s307_s11), 2 }
  0x32   : > { %s297_s21 = scalar_lea.vmem %s1273_s3, %s718_s18  ;;  %s769_s23 = sshll.u32 %s1311_s28, 6 }
  0x33   : > { %s1162_s14 = scalar_lea.vmem %s1274_s4, %s769_s23  ;;  %s793_s13 = smul.u32 12, %s1313_s11 }
  0x34   : > { %s287_s27 = scalar_lea.vmem [#allocation9], %s1151_s26  ;;  %319 = sbr.rel (%p722_p6) target bundleno = 62 (0x3e), region = 44 }
  0x35   : > { %s1167_s25 = scalar_lea.vmem %s1275_s5, %s793_s13 }
  0x39   : > { %v781_v0 = vld [vmem:[%s297_s21] sm:$0xff]  }
  0x3a   : > { %v782_v1 = vunpack.c.l.bf16 %v781_v0  ;;  %v783_v2 = vunpack.c.h.bf16 %v781_v0 }
  0x3c   : > { %324 = vst [vmem:[#allocation2] sm:$0xff] %v782_v1 }
  0x3d   : > { %325 = vst [vmem:[#allocation2 + $0x8] sm:$0xff] %v783_v2 }
  0x3e PF: > { %p723_p7 = scmp.le.s32.totalorder %s1011_s7, 0 }
  0x3f   : > { %s724_s2 = sadd.s32 (!%p723_p7), 4294967295, %s1011_s7 }
  0x40   : > { %329 = sbr.rel (%p723_p7) target bundleno = 743 (0x2e7), region = 48  ;;  %s331_s8 = sld [smem:[#allocation6 + %s724_s2]] (!%p723_p7) }
  0x45   : > { %v777_v3 = vld [vmem:[%s1162_s14 + $0x38] sm:$0xff]  ;;  %v776_v4 = vld [vmem:[%s1162_s14 + $0x30] sm:$0xff]  ;;  %v775_v5 = vld [vmem:[%s1162_s14 + $0x28] sm:$0xff]  ;;  %v426_v25 = vlaneseq  ;;  %vm431_vm1 = vcmask 146432   ;;  %vm547_vm8 = vcmask 1040384  }
  0x46   : > { %412 = vmatpush.bf16.msra.mxu0 %v777_v3  ;;  %v774_v6 = vld [vmem:[%s1162_s14 + $0x20] sm:$0xff]  ;;  %v773_v7 = vld [vmem:[%s1162_s14 + $0x18] sm:$0xff]  ;;  %s341_s9 = ssub.f32 1.0, %s331_s8  ;;  %v772_v11 = vld [vmem:[%s1162_s14 + $0x10] sm:$0xff]  ;;  %v338_v14 = vstv %s331_s8 }
  0x47   : > { %v785_v8 = vld [vmem:[%s297_s21] sm:$0xff]   ;;  %v337_v13 = vld [vmem:[#allocation2 + $0x8] sm:$0xff]  ;;  %v1181_v26 = vand.u32 127, %v426_v25 }
  0x48   : > { %v786_v9 = vunpack.c.l.bf16 %v785_v8  ;;  %v787_v10 = vunpack.c.h.bf16 %v785_v8  ;;  %v336_v12 = vld [vmem:[#allocation2] sm:$0xff]  ;;  %v342_v15 = vstv %s341_s9  ;;  %v340_v17 = vmul.f32 %v338_v14, %v337_v13  ;;  %v771_v20 = vld [vmem:[%s1162_s14 + $0x8] sm:$0xff] }
  0x49   : > { %v339_v16 = vmul.f32 %v338_v14, %v336_v12  ;;  %v770_v23 = vld [vmem:[%s1162_s14] sm:$0xff]  ;;  %vm428_vm0 = vcmp.ge.s32.totalorder %v1181_v26, 16  ;;  %v757_v33 = vadd.s32 4294967280, %v1181_v26  ;;  %v534_v61 = vld [vmem:[%s1167_s25 + $0x8] sm:$0x1] }
  0x4a   : > { %413 = vmatpush.bf16.msra.mxu0 %v776_v4  ;;  %v343_v18 = vmul.f32 %v786_v9, %v342_v15  ;;  %v344_v19 = vmul.f32 %v787_v10, %v342_v15  ;;  %v540_v62 = vunpack.c.l.b16 %v534_v61  ;;  %v778_v2 = vld [vmem:[%s1167_s25] sm:$0xff] }
  0x4c   : > { %v345_v21 = vadd.f32 %v343_v18, %v339_v16  ;;  %v346_v22 = vadd.f32 %v344_v19, %v340_v17  ;;  %v542_v0 = vpack.c.b16 %v540_v62, %v540_v62 }
  0x4e   : > { %414 = vmatpush.bf16.msra.mxu0 %v775_v5  ;;  %v347_v24 = vpack.c.bf16 %v346_v22, %v345_v21  ;;  %v549_v1 = vsel %vm547_vm8, %v542_v0, 0 }
  0x4f   : > { %557 = vmatpush.bf16.msra.mxu1 %v549_v1 }
  0x52   : > { %415 = vmatpush.bf16.msra.mxu0 %v774_v6 }
  0x53   : > { %558 = vmatpush.bf16.msra.mxu1 %v778_v2 }
  0x56   : > { %416 = vmatpush.bf16.msra.mxu0 %v773_v7 }
  0x5a   : > { %417 = vmatpush.bf16.msra.mxu0 %v772_v11 }
  0x5e   : > { %418 = vmatpush.bf16.msra.mxu0 %v771_v20 }
  0x62   : > { %419 = vmatpush.bf16.msra.mxu0 %v770_v23 }
  0x65   : > { %420 = vmatmul.bf16.vlgmr.msra.gmra.mxu0 %v347_v24 }
  0xe2   : > { %v1184_v27 = vpop.f32.mrf.mxu0 }
  0xe3   : > { %v429_v28 = vsel %vm428_vm0, %v1184_v27, -inf }
  0xe4   : > { %v432_v29 = vsel %vm431_vm1, %v429_v28, -inf }
  0xe5   : > { %433 = vmax.xlane.f32.xlu0 %v432_v29 }
  0xea   : > { %v1190_v30 = vpop.f32.mrf.mxu0 }
  0xeb   : > { %v430_v31 = vsel %vm428_vm0, %v1190_v30, -inf }
  0xec   : > { %v435_v32 = vsel %vm431_vm1, %v430_v31, -inf }
  0xed   : > { %436 = vmax.xlane.f32.xlu0 %v435_v32 }
 0x158   : > { %v434_v34 = vpop.xlane.xlu0 %433 }
 0x159   : > { %v438_v35 = vsub.f32 %v429_v28, %v434_v34  ;;  %vm478_vm2 = vcmp.eq.f32.partialorder %v1184_v27, %v434_v34 }
 0x15a   : > { %vm480_vm3 = vmand %vm428_vm0, %vm478_vm2 }
 0x15b   : > { %v440_v36 = vmul.f32 1.442695, %v438_v35  ;;  %v483_v37 = vsel %vm480_vm3, %v757_v33, 2 }
 0x15c   : > { %v485_v38 = vsel %vm431_vm1, %v483_v37, 2147483647 }
 0x15d   : > { %880 = vpow2.f32 %v440_v36  ;;  %v487_v39 = vshra.s32 %v485_v38, 16  ;;  %v486_v52 = vand.u32 65535, %v485_v38 }
 0x15f   : > { %v489_v40 = vcvt.s32.f32 %v487_v39  ;;  %v488_v54 = vcvt.s32.f32 %v486_v52 }
 0x160   : > { %v437_v41 = vpop.xlane.xlu0 %436 }
 0x161   : > { %v439_v42 = vsub.f32 %v430_v31, %v437_v41  ;;  %vm479_vm4 = vcmp.eq.f32.partialorder %v1190_v30, %v437_v41  ;;  %490 = vmin.xlane.f32.xlu1 %v489_v40 }
 0x162   : > { %vm481_vm5 = vmand %vm428_vm0, %vm479_vm4 }
 0x163   : > { %v881_v43 = vpop.eup %880  ;;  %v442_v44 = vmul.f32 1.442695, %v439_v42  ;;  %v484_v45 = vsel %vm481_vm5, %v757_v33, 2 }
 0x164   : > { %v444_v46 = vsel %vm431_vm1, %v881_v43, 0.0  ;;  %v500_v47 = vsel %vm431_vm1, %v484_v45, 2147483647 }
 0x165   : > { %882 = vpow2.f32 %v442_v44  ;;  %445 = vadd.xlane.f32.xlu2 %v444_v46  ;;  %v502_v48 = vshra.s32 %v500_v47, 16  ;;  %v501_v56 = vand.u32 65535, %v500_v47 }
 0x167   : > { %v504_v49 = vcvt.s32.f32 %v502_v48  ;;  %v503_v58 = vcvt.s32.f32 %v501_v56 }
 0x169   : > { %505 = vmin.xlane.f32.xlu1 %v504_v49 }
 0x16b   : > { %v883_v50 = vpop.eup %882 }
 0x16c   : > { %v447_v51 = vsel %vm431_vm1, %v883_v50, 0.0 }
 0x16d   : > { %448 = vadd.xlane.f32.xlu2 %v447_v51 }
 0x1d4   : > { %v491_v53 = vpop.xlane.xlu1 %490 }
 0x1d5   : > { %vm492_vm6 = vcmp.eq.f32.partialorder %v489_v40, %v491_v53  ;;  %v497_v9 = vcvt.f32.s32 %v491_v53 }
 0x1d6   : > { %v493_v55 = vsel %vm492_vm6, %v488_v54, inf }
 0x1d7   : > { %494 = vmin.xlane.f32.xlu0 %v493_v55  ;;  %v498_v13 = vshll.u32 %v497_v9, 16 }
 0x1d8   : > { %v446_v60 = vpop.xlane.xlu2 %445 }
 0x1d9   : > { %884 = vrcp.f32 %v446_v60  ;;  %vm455_vm11 = vweird.f32 %v446_v60  ;;  %v459_v18 = vand.u32 2147483647, %v446_v60  ;;  %v461_v19 = vand.u32 2147483648, %v446_v60 }
 0x1db   : > { %vm460_vm15 = vcmp.eq.f32.partialorder %v459_v18, 8.507059e+37  ;;  %v462_v29 = vor.u32 1.1754944e-38, %v461_v19 }
 0x1dc   : > { %v506_v57 = vpop.xlane.xlu1 %505 }
 0x1dd   : > { %vm507_vm7 = vcmp.eq.f32.partialorder %v504_v49, %v506_v57  ;;  %v512_v22 = vcvt.f32.s32 %v506_v57 }
 0x1de   : > { %v508_v59 = vsel %vm507_vm7, %v503_v58, inf }
 0x1df   : > { %509 = vmin.xlane.f32.xlu1 %v508_v59  ;;  %v885_v3 = vpop.eup %884  ;;  %v513_v33 = vshll.u32 %v512_v22, 16 }
 0x1e0   : > { %v449_v63 = vpop.xlane.xlu2 %448  ;;  %v451_v5 = vmul.f32 %v885_v3, %v446_v60  ;;  %vm456_vm9 = vweird.f32 %v885_v3 }
 0x1e1   : > { %886 = vrcp.f32 %v449_v63  ;;  %v475_v20 = vand.u32 2147483648, %v449_v63  ;;  %vm1209_vm12 = vmor %vm455_vm11, %vm456_vm9  ;;  %vm469_vm13 = vweird.f32 %v449_v63  ;;  %v473_v23 = vand.u32 2147483647, %v449_v63 }
 0x1e2   : > { %v452_v7 = vsub.f32 1.0, %v451_v5 }
 0x1e3   : > { %v476_v31 = vor.u32 1.1754944e-38, %v475_v20  ;;  %vm474_vm0 = vcmp.eq.f32.partialorder %v473_v23, 8.507059e+37 }
 0x1e4   : > { %v453_v10 = vmul.f32 %v885_v3, %v452_v7 }
 0x1e6   : > { %v454_v15 = vadd.f32 %v885_v3, %v453_v10 }
 0x1e7   : > { %v887_v4 = vpop.eup %886 }
 0x1e8   : > { %v465_v6 = vmul.f32 %v887_v4, %v449_v63  ;;  %vm470_vm10 = vweird.f32 %v887_v4  ;;  %v458_v28 = vsel %vm1209_vm12, %v885_v3, %v454_v15 }
 0x1e9   : > { %vm471_vm14 = vmor %vm469_vm13, %vm470_vm10  ;;  %v463_v37 = vsel %vm460_vm15, %v462_v29, %v458_v28 }
 0x1ea   : > { %v466_v8 = vsub.f32 1.0, %v465_v6  ;;  %v525_v41 = vmul.f32 0.5, %v463_v37 }
 0x1ec   : > { %v467_v11 = vmul.f32 %v887_v4, %v466_v8  ;;  %v527_v43 = vmul.f32 %v525_v41, %v1184_v27 }
 0x1ee   : > { %v468_v16 = vadd.f32 %v887_v4, %v467_v11 }
 0x1f0   : > { %v472_v25 = vsel %vm471_vm14, %v887_v4, %v468_v16 }
 0x1f1   : > { %v477_v36 = vsel %vm474_vm0, %v476_v31, %v472_v25 }
 0x1f2   : > { %v526_v39 = vmul.f32 0.5, %v477_v36 }
 0x1f4   : > { %v528_v44 = vmul.f32 %v526_v39, %v1190_v30 }
 0x24a   : > { %v495_v12 = vpop.xlane.xlu0 %494 }
 0x24b   : > { %v496_v14 = vcvt.f32.s32 %v495_v12 }
 0x24d   : > { %v499_v17 = vadd.s32 %v498_v13, %v496_v14 }
 0x24f   : > { %v515_v24 = vmul.u32 8, %v499_v17 }
 0x251   : > { %v519_v34 = vadd.s32 8, %v515_v24  ;;  %vm517_vm3 = vcmp.ge.s32.totalorder %v1181_v26, %v515_v24 }
 0x252   : > { %v510_v32 = vpop.xlane.xlu1 %509 }
 0x253   : > { %v511_v35 = vcvt.f32.s32 %v510_v32  ;;  %vm521_vm2 = vcmp.lt.s32.totalorder %v1181_v26, %v519_v34 }
 0x254   : > { %vm523_vm4 = vmand %vm517_vm3, %vm521_vm2 }
 0x255   : > { %v514_v38 = vadd.s32 %v513_v33, %v511_v35  ;;  %v529_v45 = vsel %vm523_vm4, %v527_v43, 0.0 }
 0x257   : > { %v516_v40 = vmul.u32 8, %v514_v38 }
 0x259   : > { %v520_v42 = vadd.s32 8, %v516_v40  ;;  %vm518_vm5 = vcmp.ge.s32.totalorder %v1181_v26, %v516_v40 }
 0x25b   : > { %vm522_vm6 = vcmp.lt.s32.totalorder %v1181_v26, %v520_v42 }
 0x25c   : > { %vm524_vm7 = vmand %vm518_vm5, %vm522_vm6 }
 0x25d   : > { %v530_v46 = vsel %vm524_vm7, %v528_v44, 0.0 }
 0x25e   : > { %v531_v47 = vpack.c.bf16 %v530_v46, %v529_v45 }
 0x260   : > { %762 = vmatmul.msk.bf16.vlgmr.msra.gmra.mxu1 %vm431_vm1, %v531_v47 }
 0x2dd   : > { %v560_v48 = vpop.f32.mrf.mxu1 }
 0x2de   : > { %565 = vst [vmem:[#allocation2] sm:$0xff] %v560_v48 }
 0x2e5   : > { %v562_v49 = vpop.f32.mrf.mxu1 }
 0x2e6   : > { %566 = vst [vmem:[#allocation2 + $0x8] sm:$0xff] %v562_v49 }
 0x2e7 PF: > { %p763_p8 = scmp.ne.s32.totalorder %s1011_s7, 3 }
 0x2e9   : > { %570 = sbr.rel (%p763_p8) target bundleno = 754 (0x2f2), region = 52 }
 0x2ee   : > { %v571_v50 = vld [vmem:[#allocation2] sm:$0xff]  ;;  %v572_v26 = vld [vmem:[#allocation2 + $0x8] sm:$0xff] }
 0x2ef   : > { %v791_v27 = vpack.c.bf16 %v572_v26, %v571_v50 }
 0x2f1   : > { %792 = vst [vmem:[%s287_s27] sm:$0xff] %v791_v27  }
 0x2f2 PF: > { %s779_s13 = sshll.u32 %s1015_s1, 3  ;;  %s590_s11 = sshll.u32 %s287_s27, 4  ;;  %s591_s11 = int_to_ptr.vmem [resolvable:$true] %s590_s11 }
 0x2f3   : > { %s589_s28 = scalar_lea.hbm %s1276_s6, %s779_s13  ;;  %s1292_s12 = sand.u32 1, %s1003_s30  }
 0x2f4   : > { %s592_s7 = sshll.u32 %s589_s28, 4  ;;  %s578_s15 = scalar_lea.sflag [#allocation7], %s1292_s12  ;;  %s593_s7 = int_to_ptr.hbm [resolvable:$true] %s592_s7 }
 0x2f5   : > { %s941_s18 = sshra.s32 %s593_s7, 4  ;;  %s947_s21 = scalar_lea.hbm %s1276_s6, 16  ;;  %s942_s18 = int_to_ptr.hbm [resolvable:$true] %s941_s18 }
 0x2f6   : > { %s943_s19 = scalar_lea.hbm %s942_s18, 8  ;;  %p948_p13 = scmp.lt.s32.totalorder %s942_s18, %s1276_s6 }
 0x2f7   : > { %p944_p10 = scmp.ne.s32.totalorder %s942_s18, %s943_s19  ;;  %p949_p0 = scmp.lt.s32.totalorder %s947_s21, %s943_s19 }
 0x2f9   : > { %p945_p11 = pnand %p944_p10, %p1125_p3  ;;  %p950_p1 = por %p949_p0, %p948_p13 }
 0x2fb   : > { %p946_p12 = pneg %p945_p11 }
 0x2fd   : > { %p951_p2 = pnand %p950_p1, %p946_p12 }
 0x2ff   : > { %954 = shalt.err (!%p951_p2)
}
 0x300   : > { %s1032_s26 = smov 64   ;;  %s1033_s27 = smov 4  }
 0x301   : > { %798 = dma.vmem_to_hbm [thread:$0]  (%p1125_p3), %s591_s11, 128, %s593_s7, %s578_s15, %s1032_s26, %s1032_s26, %s1033_s27  }
 0x302 PF: > { %p810_p4 = scmp.ge.s32.totalorder %s1027_s10, 2  ;;  %s607_s2 = sand.u32 1, %s999_s29  }
 0x303   : > { %s608_s8 = scalar_lea.sflag [#allocation7], %s607_s2 }
 0x304   : > { %p805_p5 = pnand %p810_p4, %p1135_p9 }
 0x306   : > { %p806_p6 = pneg %p805_p5 }
 0x308   : > { %994 = dma.done.wait (%p806_p6), %s608_s8, 128  }
 0x309   : > { %996 = vsyncadd (%p806_p6), %s608_s8, 4294967168  ;;  %s33_s10 = sadd.s32 1, %s1027_s10   ;;  %s1293_s7 = sld [smem:[#allocation13_spill]] }
 0x30a   : > { %p30_p7 = scmp.ge.s32.totalorder %s33_s10, 10   ;;  %s1294_s1 = sld [smem:[#allocation14_spill]] }
 0x30b   : > { %s1295_s8 = sld [smem:[#allocation15_spill]]  ;;  %s1297_s29 = smov %s1003_s30 }
 0x30c   : > { %s1296_s9 = sld [smem:[#allocation16_spill]]  ;;  %s1298_s30 = smov %s1007_s0 }
 0x30d   : > { %s1299_s0 = smov %s1145_s22  ;;  %32 = sbr.rel (!%p30_p7) target bundleno = 14 (0xe), region = 94 }
 0x312   :  { %614 = vsyncpa [#allocation7], 1 }
 0x313   :  { %616 = vsyncpa [#allocation7 + $0x1], 1 }
 0x314   :  { %617 = vsyncpa [#allocation8], 1 }
 0x315   :  { %619 = vsyncpa [#allocation8 + $0x1], 1 }

</bundles_post_ra>
